<compile_context>
chip_gen: v5e
topology: v5e:2x2
jax: 0.10.0
libtpu: 0.0.40
codegen_flags: <defaults>
</compile_context>

<pallas_src>
import jax
import jax.numpy as jnp
from jax.experimental import pallas as pl
from jax.experimental.pallas import tpu as pltpu


# ----------------------------------------------------------------------------
# Faithful forward: empty module, no params, no inputs, returns None.
# No Pallas kernel is launched here — there is nothing to lower.
# ----------------------------------------------------------------------------
def face_mae_forward():
    # TODO(synk): reference forward() has no body; nothing to lower to Pallas.
    return None


# ----------------------------------------------------------------------------
# Pure-identity wrapper: per perf feedback, a semantic identity should never
# launch a kernel (an aliased identity still costs a full HBM read + write).
# ----------------------------------------------------------------------------
def identity_pallas(x):
    return x


# ----------------------------------------------------------------------------
# Demo Pallas copy kernel — NOT part of face_mae semantics.  Single block,
# lane-dense, no aliasing, cost-estimated as pure bandwidth.
# ----------------------------------------------------------------------------
def _copy_kernel(x_ref, o_ref):
    o_ref[...] = x_ref[...]


def copy_pallas(x):
    rows, cols = x.shape
    dtype_bytes = jnp.dtype(x.dtype).itemsize
    return pl.pallas_call(
        _copy_kernel,
        out_shape=jax.ShapeDtypeStruct((rows, cols), x.dtype),
        grid=(1,),  # single block: no per-step pipeline overhead to pay twice
        in_specs=[pl.BlockSpec((rows, cols), lambda i: (0, 0))],
        out_specs=pl.BlockSpec((rows, cols), lambda i: (0, 0)),
        cost_estimate=pl.CostEstimate(
            flops=0,
            transcendentals=0,
            bytes_accessed=2 * rows * cols * dtype_bytes,
        ),
    )(x)


if __name__ == "__main__":
    # Deterministic small input (only used by the demo kernel).
    key = jax.random.PRNGKey(0)
    shape = (256, 512)  # one lane-dense block: 512 KiB f32, fits any VMEM budget
    x = jax.random.normal(key, shape, dtype=jnp.float32)

    # Identity path: no kernel launch (optimal for a no-compute op).
    y_id = identity_pallas(x)
    assert y_id is x

    # Demo Pallas kernel: run once and block on it.
    y = copy_pallas(x)
    jax.block_until_ready(y)
    assert y.shape == shape and y.dtype == jnp.float32
    assert bool(jnp.allclose(y, x))

    # Faithful face_mae forward: returns None, matching the reference module.
    out = face_mae_forward()
    assert out is None

    print("KERNEL_OK")
</pallas_src>

<mosaic_0001>
module attributes {stable_mosaic.version = 11 : i64} {
  func.func @_copy_kernel(%arg0: i32, %arg1: memref<256x512xf32, #tpu.memory_space<vmem>>, %arg2: memref<256x512xf32, #tpu.memory_space<vmem>>) attributes {dimension_semantics = [#tpu.dimension_semantics<arbitrary>], iteration_bounds = array<i64: 1>, scalar_prefetch = 0 : i64, scratch_operands = 0 : i64, tpu.core_type = #tpu.core_type<tc>, window_params = [{pipeline_mode = #tpu.pipeline_mode<synchronous>, transform_indices = @transform_0, window_bounds = array<i64: 256, 512>}, {pipeline_mode = #tpu.pipeline_mode<synchronous>, transform_indices = @transform_1, window_bounds = array<i64: 256, 512>}]} {
    %c0 = arith.constant 0 : index
    %c0_0 = arith.constant 0 : index
    %0 = vector.load %arg1[%c0, %c0_0] : memref<256x512xf32, #tpu.memory_space<vmem>>, vector<256x512xf32>
    %c0_1 = arith.constant 0 : index
    %c0_2 = arith.constant 0 : index
    %1 = vector.load %arg2[%c0_1, %c0_2] : memref<256x512xf32, #tpu.memory_space<vmem>>, vector<256x512xf32>
    tpu.vector_store %arg2[%c0_1, %c0_2], %0 {strides = array<i32>} : memref<256x512xf32, #tpu.memory_space<vmem>>, vector<256x512xf32>,
    return
  }
  func.func @transform_0(%arg0: i32) -> (i32, i32) {
    %c0_i32 = arith.constant 0 : i32
    %c0_i32_0 = arith.constant 0 : i32
    %c0_i32_1 = arith.constant 0 : i32
    return %c0_i32, %c0_i32_0 : i32, i32
  }
  func.func @transform_1(%arg0: i32) -> (i32, i32) {
    %c0_i32 = arith.constant 0 : i32
    %c0_i32_0 = arith.constant 0 : i32
    %c0_i32_1 = arith.constant 0 : i32
    return %c0_i32, %c0_i32_0 : i32, i32
  }
}

</mosaic_0001>

<bundles_post_ra>
// kernel: tpu_custom_call.1
= control target key start
LH: loop header
LB: loop body
LE: loop exit
PB: predicated region body
PF: predicated region fallthrough
CT: control target
= control target key end

     0   :  { %6 = vsyncpa [#allocation3], 0  ;;  %s382_s0 = inlined_call_operand.hbm [shape: f32[256,512], index: 0, kind: input, shape index: {}]   ;;  %s383_s1 = inlined_call_operand.hbm [shape: f32[256,512], index: 1, kind: output, shape index: {}]  }
   0x1   :  { %7 = vsyncpa [#allocation4], 0  ;;  %s12_s8 = sshll.u32 %s382_s0, 4  ;;  %s356_s9 = smov [#allocation2]   ;;  %s13_s8 = int_to_ptr.hbm [resolvable:$true] %s12_s8 }
   0x2   :  { %s14_s10 = sshll.u32 %s356_s9, 4  ;;  %s357_s11 = smov 512   ;;  %s15_s10 = int_to_ptr.vmem [resolvable:$true] %s14_s10 }
   0x3   :  { %s358_s12 = smov 32  }
   0x4   :  { %20 = dma.hbm_to_vmem [thread:$0]  %s13_s8, 16384, %s15_s10, [#allocation3], %s357_s11, %s357_s11, %s358_s12  }
   0x5   :  { %352 = dma.done.wait [#allocation3], 16384  }
   0x6   :  { %353 = vsyncadd [#allocation3], 4294950912  ;;  %v25_v0 = vld [vmem:[#allocation2] sm:$0xff]  ;;  %v26_v1 = vld [vmem:[#allocation2 + $0x8] sm:$0xff]  ;;  %s359_s0 = smov [#allocation5]   ;;  %s287_s16 = sshll.u32 %s383_s1, 4  ;;  %s288_s16 = int_to_ptr.hbm [resolvable:$true] %s287_s16 }
   0x7   :  { %v27_v2 = vld [vmem:[#allocation2 + $0x10] sm:$0xff]  ;;  %153 = vst [vmem:[#allocation5] sm:$0xff] %v25_v0  ;;  %v28_v3 = vld [vmem:[#allocation2 + $0x18] sm:$0xff]  ;;  %v29_v4 = vld [vmem:[#allocation2 + $0x20] sm:$0xff]  ;;  %s285_s13 = sshll.u32 %s359_s0, 4  ;;  %s286_s13 = int_to_ptr.vmem [resolvable:$true] %s285_s13 }
   0x8   :  { %154 = vst [vmem:[#allocation5 + $0x8] sm:$0xff] %v26_v1  ;;  %v30_v5 = vld [vmem:[#allocation2 + $0x28] sm:$0xff]  ;;  %v31_v6 = vld [vmem:[#allocation2 + $0x30] sm:$0xff]  ;;  %v32_v7 = vld [vmem:[#allocation2 + $0x38] sm:$0xff] }
   0x9   :  { %155 = vst [vmem:[#allocation5 + $0x10] sm:$0xff] %v27_v2  ;;  %v33_v8 = vld [vmem:[#allocation2 + $0x40] sm:$0xff]  ;;  %v34_v9 = vld [vmem:[#allocation2 + $0x48] sm:$0xff]  ;;  %v35_v10 = vld [vmem:[#allocation2 + $0x50] sm:$0xff] }
   0xa   :  { %156 = vst [vmem:[#allocation5 + $0x18] sm:$0xff] %v28_v3  ;;  %v36_v11 = vld [vmem:[#allocation2 + $0x58] sm:$0xff]  ;;  %v37_v12 = vld [vmem:[#allocation2 + $0x60] sm:$0xff]  ;;  %v38_v13 = vld [vmem:[#allocation2 + $0x68] sm:$0xff] }
   0xb   :  { %157 = vst [vmem:[#allocation5 + $0x20] sm:$0xff] %v29_v4  ;;  %v39_v14 = vld [vmem:[#allocation2 + $0x70] sm:$0xff]  ;;  %v40_v15 = vld [vmem:[#allocation2 + $0x78] sm:$0xff]  ;;  %v41_v16 = vld [vmem:[#allocation2 + $0x80] sm:$0xff] }
   0xc   :  { %158 = vst [vmem:[#allocation5 + $0x28] sm:$0xff] %v30_v5  ;;  %v42_v17 = vld [vmem:[#allocation2 + $0x88] sm:$0xff]  ;;  %v43_v18 = vld [vmem:[#allocation2 + $0x90] sm:$0xff]  ;;  %v44_v19 = vld [vmem:[#allocation2 + $0x98] sm:$0xff] }
   0xd   :  { %159 = vst [vmem:[#allocation5 + $0x30] sm:$0xff] %v31_v6  ;;  %v45_v20 = vld [vmem:[#allocation2 + $0xa0] sm:$0xff]  ;;  %v46_v21 = vld [vmem:[#allocation2 + $0xa8] sm:$0xff]  ;;  %v47_v22 = vld [vmem:[#allocation2 + $0xb0] sm:$0xff] }
   0xe   :  { %160 = vst [vmem:[#allocation5 + $0x38] sm:$0xff] %v32_v7  ;;  %v48_v23 = vld [vmem:[#allocation2 + $0xb8] sm:$0xff]  ;;  %v49_v24 = vld [vmem:[#allocation2 + $0xc0] sm:$0xff]  ;;  %v50_v25 = vld [vmem:[#allocation2 + $0xc8] sm:$0xff] }
   0xf   :  { %161 = vst [vmem:[#allocation5 + $0x40] sm:$0xff] %v33_v8  ;;  %v51_v26 = vld [vmem:[#allocation2 + $0xd0] sm:$0xff]  ;;  %v52_v27 = vld [vmem:[#allocation2 + $0xd8] sm:$0xff]  ;;  %v53_v28 = vld [vmem:[#allocation2 + $0xe0] sm:$0xff] }
  0x10   :  { %162 = vst [vmem:[#allocation5 + $0x48] sm:$0xff] %v34_v9  ;;  %v54_v29 = vld [vmem:[#allocation2 + $0xe8] sm:$0xff]  ;;  %v55_v30 = vld [vmem:[#allocation2 + $0xf0] sm:$0xff]  ;;  %v56_v31 = vld [vmem:[#allocation2 + $0xf8] sm:$0xff] }
  0x11   :  { %163 = vst [vmem:[#allocation5 + $0x50] sm:$0xff] %v35_v10  ;;  %v57_v32 = vld [vmem:[#allocation2 + $0x100] sm:$0xff]  ;;  %v58_v33 = vld [vmem:[#allocation2 + $0x108] sm:$0xff]  ;;  %v59_v34 = vld [vmem:[#allocation2 + $0x110] sm:$0xff] }
  0x12   :  { %164 = vst [vmem:[#allocation5 + $0x58] sm:$0xff] %v36_v11  ;;  %v60_v35 = vld [vmem:[#allocation2 + $0x118] sm:$0xff]  ;;  %v61_v36 = vld [vmem:[#allocation2 + $0x120] sm:$0xff]  ;;  %v62_v37 = vld [vmem:[#allocation2 + $0x128] sm:$0xff] }
  0x13   :  { %165 = vst [vmem:[#allocation5 + $0x60] sm:$0xff] %v37_v12  ;;  %v63_v38 = vld [vmem:[#allocation2 + $0x130] sm:$0xff]  ;;  %v64_v39 = vld [vmem:[#allocation2 + $0x138] sm:$0xff]  ;;  %v65_v40 = vld [vmem:[#allocation2 + $0x140] sm:$0xff] }
  0x14   :  { %166 = vst [vmem:[#allocation5 + $0x68] sm:$0xff] %v38_v13  ;;  %v66_v41 = vld [vmem:[#allocation2 + $0x148] sm:$0xff]  ;;  %v67_v42 = vld [vmem:[#allocation2 + $0x150] sm:$0xff]  ;;  %v68_v43 = vld [vmem:[#allocation2 + $0x158] sm:$0xff] }
  0x15   :  { %167 = vst [vmem:[#allocation5 + $0x70] sm:$0xff] %v39_v14  ;;  %v69_v44 = vld [vmem:[#allocation2 + $0x160] sm:$0xff]  ;;  %v70_v45 = vld [vmem:[#allocation2 + $0x168] sm:$0xff]  ;;  %v71_v46 = vld [vmem:[#allocation2 + $0x170] sm:$0xff] }
  0x16   :  { %168 = vst [vmem:[#allocation5 + $0x78] sm:$0xff] %v40_v15  ;;  %v72_v47 = vld [vmem:[#allocation2 + $0x178] sm:$0xff]  ;;  %v73_v48 = vld [vmem:[#allocation2 + $0x180] sm:$0xff]  ;;  %v74_v49 = vld [vmem:[#allocation2 + $0x188] sm:$0xff] }
  0x17   :  { %169 = vst [vmem:[#allocation5 + $0x80] sm:$0xff] %v41_v16  ;;  %v75_v50 = vld [vmem:[#allocation2 + $0x190] sm:$0xff]  ;;  %v76_v51 = vld [vmem:[#allocation2 + $0x198] sm:$0xff]  ;;  %v77_v52 = vld [vmem:[#allocation2 + $0x1a0] sm:$0xff] }
  0x18   :  { %170 = vst [vmem:[#allocation5 + $0x88] sm:$0xff] %v42_v17  ;;  %v78_v53 = vld [vmem:[#allocation2 + $0x1a8] sm:$0xff]  ;;  %v79_v54 = vld [vmem:[#allocation2 + $0x1b0] sm:$0xff]  ;;  %v80_v55 = vld [vmem:[#allocation2 + $0x1b8] sm:$0xff] }
  0x19   :  { %171 = vst [vmem:[#allocation5 + $0x90] sm:$0xff] %v43_v18  ;;  %v81_v56 = vld [vmem:[#allocation2 + $0x1c0] sm:$0xff]  ;;  %v82_v57 = vld [vmem:[#allocation2 + $0x1c8] sm:$0xff]  ;;  %v83_v58 = vld [vmem:[#allocation2 + $0x1d0] sm:$0xff] }
  0x1a   :  { %172 = vst [vmem:[#allocation5 + $0x98] sm:$0xff] %v44_v19  ;;  %v84_v59 = vld [vmem:[#allocation2 + $0x1d8] sm:$0xff]  ;;  %v85_v60 = vld [vmem:[#allocation2 + $0x1e0] sm:$0xff]  ;;  %v86_v61 = vld [vmem:[#allocation2 + $0x1e8] sm:$0xff] }
  0x1b   :  { %173 = vst [vmem:[#allocation5 + $0xa0] sm:$0xff] %v45_v20  ;;  %v87_v62 = vld [vmem:[#allocation2 + $0x1f0] sm:$0xff]  ;;  %v88_v63 = vld [vmem:[#allocation2 + $0x1f8] sm:$0xff]  ;;  %v89_v0 = vld [vmem:[#allocation2 + $0x200] sm:$0xff] }
  0x1c   :  { %174 = vst [vmem:[#allocation5 + $0xa8] sm:$0xff] %v46_v21  ;;  %v90_v1 = vld [vmem:[#allocation2 + $0x208] sm:$0xff]  ;;  %v91_v2 = vld [vmem:[#allocation2 + $0x210] sm:$0xff]  ;;  %v92_v3 = vld [vmem:[#allocation2 + $0x218] sm:$0xff] }
  0x1d   :  { %175 = vst [vmem:[#allocation5 + $0xb0] sm:$0xff] %v47_v22  ;;  %v93_v4 = vld [vmem:[#allocation2 + $0x220] sm:$0xff]  ;;  %v94_v5 = vld [vmem:[#allocation2 + $0x228] sm:$0xff]  ;;  %v95_v6 = vld [vmem:[#allocation2 + $0x230] sm:$0xff] }
  0x1e   :  { %176 = vst [vmem:[#allocation5 + $0xb8] sm:$0xff] %v48_v23  ;;  %v96_v7 = vld [vmem:[#allocation2 + $0x238] sm:$0xff]  ;;  %v97_v8 = vld [vmem:[#allocation2 + $0x240] sm:$0xff]  ;;  %v98_v9 = vld [vmem:[#allocation2 + $0x248] sm:$0xff] }
  0x1f   :  { %177 = vst [vmem:[#allocation5 + $0xc0] sm:$0xff] %v49_v24  ;;  %v99_v10 = vld [vmem:[#allocation2 + $0x250] sm:$0xff]  ;;  %v100_v11 = vld [vmem:[#allocation2 + $0x258] sm:$0xff]  ;;  %v101_v12 = vld [vmem:[#allocation2 + $0x260] sm:$0xff] }
  0x20   :  { %178 = vst [vmem:[#allocation5 + $0xc8] sm:$0xff] %v50_v25  ;;  %v102_v13 = vld [vmem:[#allocation2 + $0x268] sm:$0xff]  ;;  %v103_v14 = vld [vmem:[#allocation2 + $0x270] sm:$0xff]  ;;  %v104_v15 = vld [vmem:[#allocation2 + $0x278] sm:$0xff] }
  0x21   :  { %179 = vst [vmem:[#allocation5 + $0xd0] sm:$0xff] %v51_v26  ;;  %v105_v16 = vld [vmem:[#allocation2 + $0x280] sm:$0xff]  ;;  %v106_v17 = vld [vmem:[#allocation2 + $0x288] sm:$0xff]  ;;  %v107_v18 = vld [vmem:[#allocation2 + $0x290] sm:$0xff] }
  0x22   :  { %180 = vst [vmem:[#allocation5 + $0xd8] sm:$0xff] %v52_v27  ;;  %v108_v19 = vld [vmem:[#allocation2 + $0x298] sm:$0xff]  ;;  %v109_v20 = vld [vmem:[#allocation2 + $0x2a0] sm:$0xff]  ;;  %v110_v21 = vld [vmem:[#allocation2 + $0x2a8] sm:$0xff] }
  0x23   :  { %181 = vst [vmem:[#allocation5 + $0xe0] sm:$0xff] %v53_v28  ;;  %v111_v22 = vld [vmem:[#allocation2 + $0x2b0] sm:$0xff]  ;;  %v112_v23 = vld [vmem:[#allocation2 + $0x2b8] sm:$0xff]  ;;  %v113_v24 = vld [vmem:[#allocation2 + $0x2c0] sm:$0xff] }
  0x24   :  { %182 = vst [vmem:[#allocation5 + $0xe8] sm:$0xff] %v54_v29  ;;  %v114_v25 = vld [vmem:[#allocation2 + $0x2c8] sm:$0xff]  ;;  %v115_v26 = vld [vmem:[#allocation2 + $0x2d0] sm:$0xff]  ;;  %v116_v27 = vld [vmem:[#allocation2 + $0x2d8] sm:$0xff] }
  0x25   :  { %183 = vst [vmem:[#allocation5 + $0xf0] sm:$0xff] %v55_v30  ;;  %v117_v28 = vld [vmem:[#allocation2 + $0x2e0] sm:$0xff]  ;;  %v118_v29 = vld [vmem:[#allocation2 + $0x2e8] sm:$0xff]  ;;  %v119_v30 = vld [vmem:[#allocation2 + $0x2f0] sm:$0xff] }
  0x26   :  { %184 = vst [vmem:[#allocation5 + $0xf8] sm:$0xff] %v56_v31  ;;  %v120_v31 = vld [vmem:[#allocation2 + $0x2f8] sm:$0xff] }
  0x27   :  { %185 = vst [vmem:[#allocation5 + $0x100] sm:$0xff] %v57_v32  ;;  %v121_v32 = vld [vmem:[#allocation2 + $0x300] sm:$0xff] }
  0x28   :  { %186 = vst [vmem:[#allocation5 + $0x108] sm:$0xff] %v58_v33  ;;  %v122_v33 = vld [vmem:[#allocation2 + $0x308] sm:$0xff] }
  0x29   :  { %187 = vst [vmem:[#allocation5 + $0x110] sm:$0xff] %v59_v34  ;;  %v123_v34 = vld [vmem:[#allocation2 + $0x310] sm:$0xff] }
  0x2a   :  { %188 = vst [vmem:[#allocation5 + $0x118] sm:$0xff] %v60_v35  ;;  %v124_v35 = vld [vmem:[#allocation2 + $0x318] sm:$0xff] }
  0x2b   :  { %189 = vst [vmem:[#allocation5 + $0x120] sm:$0xff] %v61_v36  ;;  %v125_v36 = vld [vmem:[#allocation2 + $0x320] sm:$0xff] }
  0x2c   :  { %190 = vst [vmem:[#allocation5 + $0x128] sm:$0xff] %v62_v37  ;;  %v126_v37 = vld [vmem:[#allocation2 + $0x328] sm:$0xff] }
  0x2d   :  { %191 = vst [vmem:[#allocation5 + $0x130] sm:$0xff] %v63_v38  ;;  %v127_v38 = vld [vmem:[#allocation2 + $0x330] sm:$0xff] }
  0x2e   :  { %192 = vst [vmem:[#allocation5 + $0x138] sm:$0xff] %v64_v39  ;;  %v128_v39 = vld [vmem:[#allocation2 + $0x338] sm:$0xff] }
  0x2f   :  { %193 = vst [vmem:[#allocation5 + $0x140] sm:$0xff] %v65_v40  ;;  %v129_v40 = vld [vmem:[#allocation2 + $0x340] sm:$0xff] }
  0x30   :  { %194 = vst [vmem:[#allocation5 + $0x148] sm:$0xff] %v66_v41  ;;  %v130_v41 = vld [vmem:[#allocation2 + $0x348] sm:$0xff] }
  0x31   :  { %195 = vst [vmem:[#allocation5 + $0x150] sm:$0xff] %v67_v42  ;;  %v131_v42 = vld [vmem:[#allocation2 + $0x350] sm:$0xff] }
  0x32   :  { %196 = vst [vmem:[#allocation5 + $0x158] sm:$0xff] %v68_v43  ;;  %v132_v43 = vld [vmem:[#allocation2 + $0x358] sm:$0xff] }
  0x33   :  { %197 = vst [vmem:[#allocation5 + $0x160] sm:$0xff] %v69_v44  ;;  %v133_v44 = vld [vmem:[#allocation2 + $0x360] sm:$0xff] }
  0x34   :  { %198 = vst [vmem:[#allocation5 + $0x168] sm:$0xff] %v70_v45  ;;  %v134_v45 = vld [vmem:[#allocation2 + $0x368] sm:$0xff] }
  0x35   :  { %199 = vst [vmem:[#allocation5 + $0x170] sm:$0xff] %v71_v46  ;;  %v135_v46 = vld [vmem:[#allocation2 + $0x370] sm:$0xff] }
  0x36   :  { %200 = vst [vmem:[#allocation5 + $0x178] sm:$0xff] %v72_v47  ;;  %v136_v47 = vld [vmem:[#allocation2 + $0x378] sm:$0xff] }
  0x37   :  { %201 = vst [vmem:[#allocation5 + $0x180] sm:$0xff] %v73_v48  ;;  %v137_v48 = vld [vmem:[#allocation2 + $0x380] sm:$0xff] }
  0x38   :  { %202 = vst [vmem:[#allocation5 + $0x188] sm:$0xff] %v74_v49  ;;  %v138_v49 = vld [vmem:[#allocation2 + $0x388] sm:$0xff] }
  0x39   :  { %203 = vst [vmem:[#allocation5 + $0x190] sm:$0xff] %v75_v50  ;;  %v139_v50 = vld [vmem:[#allocation2 + $0x390] sm:$0xff] }
  0x3a   :  { %204 = vst [vmem:[#allocation5 + $0x198] sm:$0xff] %v76_v51  ;;  %v140_v51 = vld [vmem:[#allocation2 + $0x398] sm:$0xff] }
  0x3b   :  { %205 = vst [vmem:[#allocation5 + $0x1a0] sm:$0xff] %v77_v52  ;;  %v141_v52 = vld [vmem:[#allocation2 + $0x3a0] sm:$0xff] }
  0x3c   :  { %206 = vst [vmem:[#allocation5 + $0x1a8] sm:$0xff] %v78_v53  ;;  %v142_v53 = vld [vmem:[#allocation2 + $0x3a8] sm:$0xff] }
  0x3d   :  { %207 = vst [vmem:[#allocation5 + $0x1b0] sm:$0xff] %v79_v54  ;;  %v143_v54 = vld [vmem:[#allocation2 + $0x3b0] sm:$0xff] }
  0x3e   :  { %208 = vst [vmem:[#allocation5 + $0x1b8] sm:$0xff] %v80_v55  ;;  %v144_v55 = vld [vmem:[#allocation2 + $0x3b8] sm:$0xff] }
  0x3f   :  { %209 = vst [vmem:[#allocation5 + $0x1c0] sm:$0xff] %v81_v56  ;;  %v145_v56 = vld [vmem:[#allocation2 + $0x3c0] sm:$0xff] }
  0x40   :  { %210 = vst [vmem:[#allocation5 + $0x1c8] sm:$0xff] %v82_v57  ;;  %v146_v57 = vld [vmem:[#allocation2 + $0x3c8] sm:$0xff] }
  0x41   :  { %211 = vst [vmem:[#allocation5 + $0x1d0] sm:$0xff] %v83_v58  ;;  %v147_v58 = vld [vmem:[#allocation2 + $0x3d0] sm:$0xff] }
  0x42   :  { %212 = vst [vmem:[#allocation5 + $0x1d8] sm:$0xff] %v84_v59  ;;  %v148_v59 = vld [vmem:[#allocation2 + $0x3d8] sm:$0xff] }
  0x43   :  { %213 = vst [vmem:[#allocation5 + $0x1e0] sm:$0xff] %v85_v60  ;;  %v149_v60 = vld [vmem:[#allocation2 + $0x3e0] sm:$0xff] }
  0x44   :  { %214 = vst [vmem:[#allocation5 + $0x1e8] sm:$0xff] %v86_v61  ;;  %v150_v61 = vld [vmem:[#allocation2 + $0x3e8] sm:$0xff] }
  0x45   :  { %215 = vst [vmem:[#allocation5 + $0x1f0] sm:$0xff] %v87_v62  ;;  %v151_v62 = vld [vmem:[#allocation2 + $0x3f0] sm:$0xff] }
  0x46   :  { %216 = vst [vmem:[#allocation5 + $0x1f8] sm:$0xff] %v88_v63  ;;  %v152_v63 = vld [vmem:[#allocation2 + $0x3f8] sm:$0xff] }
  0x47   :  { %217 = vst [vmem:[#allocation5 + $0x200] sm:$0xff] %v89_v0 }
  0x48   :  { %218 = vst [vmem:[#allocation5 + $0x208] sm:$0xff] %v90_v1 }
  0x49   :  { %219 = vst [vmem:[#allocation5 + $0x210] sm:$0xff] %v91_v2 }
  0x4a   :  { %220 = vst [vmem:[#allocation5 + $0x218] sm:$0xff] %v92_v3 }
  0x4b   :  { %221 = vst [vmem:[#allocation5 + $0x220] sm:$0xff] %v93_v4 }
  0x4c   :  { %222 = vst [vmem:[#allocation5 + $0x228] sm:$0xff] %v94_v5 }
  0x4d   :  { %223 = vst [vmem:[#allocation5 + $0x230] sm:$0xff] %v95_v6 }
  0x4e   :  { %224 = vst [vmem:[#allocation5 + $0x238] sm:$0xff] %v96_v7 }
  0x4f   :  { %225 = vst [vmem:[#allocation5 + $0x240] sm:$0xff] %v97_v8 }
  0x50   :  { %226 = vst [vmem:[#allocation5 + $0x248] sm:$0xff] %v98_v9 }
  0x51   :  { %227 = vst [vmem:[#allocation5 + $0x250] sm:$0xff] %v99_v10 }
  0x52   :  { %228 = vst [vmem:[#allocation5 + $0x258] sm:$0xff] %v100_v11 }
  0x53   :  { %229 = vst [vmem:[#allocation5 + $0x260] sm:$0xff] %v101_v12 }
  0x54   :  { %230 = vst [vmem:[#allocation5 + $0x268] sm:$0xff] %v102_v13 }
  0x55   :  { %231 = vst [vmem:[#allocation5 + $0x270] sm:$0xff] %v103_v14 }
  0x56   :  { %232 = vst [vmem:[#allocation5 + $0x278] sm:$0xff] %v104_v15 }
  0x57   :  { %233 = vst [vmem:[#allocation5 + $0x280] sm:$0xff] %v105_v16 }
  0x58   :  { %234 = vst [vmem:[#allocation5 + $0x288] sm:$0xff] %v106_v17 }
  0x59   :  { %235 = vst [vmem:[#allocation5 + $0x290] sm:$0xff] %v107_v18 }
  0x5a   :  { %236 = vst [vmem:[#allocation5 + $0x298] sm:$0xff] %v108_v19 }
  0x5b   :  { %237 = vst [vmem:[#allocation5 + $0x2a0] sm:$0xff] %v109_v20 }
  0x5c   :  { %238 = vst [vmem:[#allocation5 + $0x2a8] sm:$0xff] %v110_v21 }
  0x5d   :  { %239 = vst [vmem:[#allocation5 + $0x2b0] sm:$0xff] %v111_v22 }
  0x5e   :  { %240 = vst [vmem:[#allocation5 + $0x2b8] sm:$0xff] %v112_v23 }
  0x5f   :  { %241 = vst [vmem:[#allocation5 + $0x2c0] sm:$0xff] %v113_v24 }
  0x60   :  { %242 = vst [vmem:[#allocation5 + $0x2c8] sm:$0xff] %v114_v25 }
  0x61   :  { %243 = vst [vmem:[#allocation5 + $0x2d0] sm:$0xff] %v115_v26 }
  0x62   :  { %244 = vst [vmem:[#allocation5 + $0x2d8] sm:$0xff] %v116_v27 }
  0x63   :  { %245 = vst [vmem:[#allocation5 + $0x2e0] sm:$0xff] %v117_v28 }
  0x64   :  { %246 = vst [vmem:[#allocation5 + $0x2e8] sm:$0xff] %v118_v29 }
  0x65   :  { %247 = vst [vmem:[#allocation5 + $0x2f0] sm:$0xff] %v119_v30 }
  0x66   :  { %248 = vst [vmem:[#allocation5 + $0x2f8] sm:$0xff] %v120_v31 }
  0x67   :  { %249 = vst [vmem:[#allocation5 + $0x300] sm:$0xff] %v121_v32 }
  0x68   :  { %250 = vst [vmem:[#allocation5 + $0x308] sm:$0xff] %v122_v33 }
  0x69   :  { %251 = vst [vmem:[#allocation5 + $0x310] sm:$0xff] %v123_v34 }
  0x6a   :  { %252 = vst [vmem:[#allocation5 + $0x318] sm:$0xff] %v124_v35 }
  0x6b   :  { %253 = vst [vmem:[#allocation5 + $0x320] sm:$0xff] %v125_v36 }
  0x6c   :  { %254 = vst [vmem:[#allocation5 + $0x328] sm:$0xff] %v126_v37 }
  0x6d   :  { %255 = vst [vmem:[#allocation5 + $0x330] sm:$0xff] %v127_v38 }
  0x6e   :  { %256 = vst [vmem:[#allocation5 + $0x338] sm:$0xff] %v128_v39 }
  0x6f   :  { %257 = vst [vmem:[#allocation5 + $0x340] sm:$0xff] %v129_v40 }
  0x70   :  { %258 = vst [vmem:[#allocation5 + $0x348] sm:$0xff] %v130_v41 }
  0x71   :  { %259 = vst [vmem:[#allocation5 + $0x350] sm:$0xff] %v131_v42 }
  0x72   :  { %260 = vst [vmem:[#allocation5 + $0x358] sm:$0xff] %v132_v43 }
  0x73   :  { %261 = vst [vmem:[#allocation5 + $0x360] sm:$0xff] %v133_v44 }
  0x74   :  { %262 = vst [vmem:[#allocation5 + $0x368] sm:$0xff] %v134_v45 }
  0x75   :  { %263 = vst [vmem:[#allocation5 + $0x370] sm:$0xff] %v135_v46 }
  0x76   :  { %264 = vst [vmem:[#allocation5 + $0x378] sm:$0xff] %v136_v47 }
  0x77   :  { %265 = vst [vmem:[#allocation5 + $0x380] sm:$0xff] %v137_v48 }
  0x78   :  { %266 = vst [vmem:[#allocation5 + $0x388] sm:$0xff] %v138_v49 }
  0x79   :  { %267 = vst [vmem:[#allocation5 + $0x390] sm:$0xff] %v139_v50 }
  0x7a   :  { %268 = vst [vmem:[#allocation5 + $0x398] sm:$0xff] %v140_v51 }
  0x7b   :  { %269 = vst [vmem:[#allocation5 + $0x3a0] sm:$0xff] %v141_v52 }
  0x7c   :  { %270 = vst [vmem:[#allocation5 + $0x3a8] sm:$0xff] %v142_v53 }
  0x7d   :  { %271 = vst [vmem:[#allocation5 + $0x3b0] sm:$0xff] %v143_v54 }
  0x7e   :  { %272 = vst [vmem:[#allocation5 + $0x3b8] sm:$0xff] %v144_v55 }
  0x7f   :  { %273 = vst [vmem:[#allocation5 + $0x3c0] sm:$0xff] %v145_v56 }
  0x80   :  { %274 = vst [vmem:[#allocation5 + $0x3c8] sm:$0xff] %v146_v57 }
  0x81   :  { %275 = vst [vmem:[#allocation5 + $0x3d0] sm:$0xff] %v147_v58 }
  0x82   :  { %276 = vst [vmem:[#allocation5 + $0x3d8] sm:$0xff] %v148_v59 }
  0x83   :  { %277 = vst [vmem:[#allocation5 + $0x3e0] sm:$0xff] %v149_v60 }
  0x84   :  { %278 = vst [vmem:[#allocation5 + $0x3e8] sm:$0xff] %v150_v61 }
  0x85   :  { %279 = vst [vmem:[#allocation5 + $0x3f0] sm:$0xff] %v151_v62 }
  0x86   :  { %280 = vst [vmem:[#allocation5 + $0x3f8] sm:$0xff] %v152_v63 }
  0x87   :  { %293 = dma.vmem_to_hbm [thread:$0]  %s286_s13, 16384, %s288_s16, [#allocation4], %s357_s11, %s357_s11, %s358_s12  }
  0x88   :  { %354 = dma.done.wait [#allocation4], 16384  }
  0x89   :  { %355 = vsyncadd [#allocation4], 4294950912 }
  0x8a   :  { %298 = vsyncpa [#allocation3], 1 }
  0x8b   :  { %299 = vsyncpa [#allocation4], 1 }

</bundles_post_ra>
